<compile_context>
chip_gen: v6e
topology: v6e:2x2x1
jax: 0.10.0
libtpu: 0.0.40
codegen_flags: <defaults>
</compile_context>

<pallas_src>
import functools

import jax
import jax.numpy as jnp
from jax import lax
from jax.experimental import pallas as pl
from jax.experimental.pallas import tpu as pltpu


def _int_pow(x, p_exp):
    """x ** p_exp. Small integer exponents as repeated multiplies (VALU);
    fall back to jnp.power (EUP exp/log) for anything else."""
    p_int = None
    if isinstance(p_exp, bool):
        p_int = int(p_exp)
    elif isinstance(p_exp, int):
        p_int = p_exp
    elif isinstance(p_exp, float) and float(p_exp).is_integer():
        p_int = int(p_exp)
    if p_int is not None and 0 <= p_int <= 8:
        if p_int == 0:
            return jnp.ones_like(x)
        result, y, n = None, x, p_int
        while n:
            if n & 1:
                result = y if result is None else result * y
            n >>= 1
            if n:
                y = y * y
        return result
    return jnp.power(x, jnp.float32(p_exp))


def _dice_kernel(p_ref, t_ref, num_ref, den_ref, num_acc, den_acc, *,
                 p_exp, r_rows, tq, acc_rows, mask_rows):
    k = pl.program_id(1)
    last = pl.num_programs(1) - 1

    @pl.when(k == 0)
    def _init():
        num_acc[...] = jnp.zeros_like(num_acc)
        den_acc[...] = jnp.zeros_like(den_acc)

    p = p_ref[0].astype(jnp.float32)          # (tq, 128)
    t = t_ref[0].astype(jnp.float32)

    num_term = p * t
    den_term = _int_pow(p, p_exp) + _int_pow(t, p_exp)

    def fold(x):
        # (tq,128) -> (acc_rows,128): pure-VALU vreg-wise adds (no XLU); the
        # reshape splits the sublane dim on (8,128)-tile boundaries (free).
        if acc_rows == tq:
            return x
        return x.reshape(tq // acc_rows, acc_rows, 128).sum(axis=0)

    if mask_rows:
        # Only the final k step can touch rows >= r_rows (unspecified tile
        # padding past the array end); keep the steady-state path mask-free.
        @pl.when(k < last)
        def _acc_fast():
            num_acc[...] += fold(num_term)
            den_acc[...] += fold(den_term)

        @pl.when(k == last)
        def _acc_masked():
            row = lax.broadcasted_iota(jnp.int32, (tq, 128), 0)
            valid = (k * tq + row) < r_rows
            num_acc[...] += fold(jnp.where(valid, num_term, 0.0))
            den_acc[...] += fold(jnp.where(valid, den_term, 0.0))
    else:
        num_acc[...] += fold(num_term)
        den_acc[...] += fold(den_term)

    @pl.when(k == last)
    def _finish():
        num_ref[...] = jnp.full(num_ref.shape, jnp.sum(num_acc[...]),
                                dtype=num_ref.dtype)
        den_ref[...] = jnp.full(den_ref.shape, jnp.sum(den_acc[...]),
                                dtype=den_ref.dtype)


def binary_dice_loss(predict, target, smooth=1.0, p=2, reduction="mean",
                     vmem_tile_bytes=4 * 1024 * 1024):
    """Pallas implementation of BinaryDiceLoss.forward.

    predict/target: arrays of shape [N, *] (same shape). Returns a scalar for
    reduction 'mean'/'sum', or a [N,] vector for 'none'.
    """
    assert predict.shape[0] == target.shape[0], "predict & target batch size don't match"
    n = predict.shape[0]
    pred2d = predict.reshape(n, -1)
    targ2d = target.reshape(n, -1)
    d = pred2d.shape[1]

    # Stream in native floating dtype (bf16 halves HBM bytes); only promote
    # non-float (bool / int) inputs.
    if not jnp.issubdtype(pred2d.dtype, jnp.floating):
        pred2d = pred2d.astype(jnp.float32)
    if not jnp.issubdtype(targ2d.dtype, jnp.floating):
        targ2d = targ2d.astype(jnp.float32)

    r = d // 128
    d_main = r * 128

    # Ragged (<128-element) feature tail: computed in plain JAX instead of
    # padding the full arrays (avoids a full HBM copy of both inputs).
    if d_main < d:
        p_tail = pred2d[:, d_main:].astype(jnp.float32)
        t_tail = targ2d[:, d_main:].astype(jnp.float32)
        tail_num = jnp.sum(p_tail * t_tail, axis=1)
        tail_den = jnp.sum(p_tail ** p + t_tail ** p, axis=1)
    else:
        tail_num = jnp.zeros((n,), jnp.float32)
        tail_den = jnp.zeros((n,), jnp.float32)

    if r == 0:
        # Feature dim < 128: nothing worth streaming; the tail covers it all.
        num = tail_num
        den = tail_den
    else:
        pred_main = pred2d if d_main == d else pred2d[:, :d_main]
        targ_main = targ2d if d_main == d else targ2d[:, :d_main]

        isz_p = jnp.dtype(pred_main.dtype).itemsize
        isz_t = jnp.dtype(targ_main.dtype).itemsize
        granule = max(8, 32 // min(isz_p, isz_t))   # sublane packing granule

        # Small-batch reduction split: expose 2 row-halves per sample so both
        # v7x TensorCores get work on the "parallel" batch axis even at N=1.
        s = 2 if (n < 4 and r % 2 == 0 and (r // 2) >= granule) else 1
        nb = n * s
        rb = r // s
        pred3d = pred_main.reshape(nb, rb, 128)     # free row-major view
        targ3d = targ_main.reshape(nb, rb, 128)

        # Rows per grid step from a VMEM byte budget (per input, per buffer):
        # ~4 MiB -> tq=8192 (f32) / 16384 (bf16). Never exceed rb (tail block
        # always starts in-bounds; only its trailing rows may be padding).
        cap = max(granule,
                  (vmem_tile_bytes // (128 * max(isz_p, isz_t)) // granule) * granule)
        if rb < granule:
            tq = rb                                  # full-extent block
        else:
            tq = min(cap, (rb // granule) * granule)
        k_steps = -(-rb // tq)
        mask_rows = (rb != k_steps * tq)
        acc_rows = 8 if tq % 8 == 0 else tq

        kernel = functools.partial(_dice_kernel, p_exp=p, r_rows=rb, tq=tq,
                                   acc_rows=acc_rows, mask_rows=mask_rows)

        num_out, den_out = pl.pallas_call(
            kernel,
            out_shape=(jax.ShapeDtypeStruct((nb, 8, 128), jnp.float32),
                       jax.ShapeDtypeStruct((nb, 8, 128), jnp.float32)),
            grid_spec=pltpu.PrefetchScalarGridSpec(
                num_scalar_prefetch=0,
                grid=(nb, k_steps),
                in_specs=[
                    pl.BlockSpec((1, tq, 128), lambda b, k: (b, k, 0)),
                    pl.BlockSpec((1, tq, 128), lambda b, k: (b, k, 0)),
                ],
                out_specs=[
                    pl.BlockSpec((1, 8, 128), lambda b, k: (b, 0, 0)),
                    pl.BlockSpec((1, 8, 128), lambda b, k: (b, 0, 0)),
                ],
                scratch_shapes=[
                    pltpu.VMEM((acc_rows, 128), jnp.float32),
                    pltpu.VMEM((acc_rows, 128), jnp.float32),
                ],
            ),
            compiler_params=pltpu.CompilerParams(
                dimension_semantics=("parallel", "arbitrary"),
                vmem_limit_bytes=32 * 1024 * 1024,
            ),
        )(pred3d, targ3d)

        num = num_out[:, 0, 0]
        den = den_out[:, 0, 0]
        if s > 1:
            num = num.reshape(n, s).sum(axis=1)
            den = den.reshape(n, s).sum(axis=1)
        num = num + tail_num
        den = den + tail_den

    sm = jnp.float32(smooth)
    loss = 1.0 - (num + sm) / (den + sm)
    if reduction == "mean":
        return jnp.mean(loss)
    elif reduction == "sum":
        return jnp.sum(loss)
    elif reduction == "none":
        return loss
    else:
        raise Exception("Unexpected reduction {}".format(reduction))


def _ref_dice(predict, target, smooth=1.0, p=2):
    n = predict.shape[0]
    pr = predict.reshape(n, -1).astype(jnp.float32)
    tr = target.reshape(n, -1).astype(jnp.float32)
    num = jnp.sum(pr * tr, axis=1) + smooth
    den = jnp.sum(pr ** p + tr ** p, axis=1) + smooth
    return 1.0 - num / den


if __name__ == "__main__":
    key = jax.random.PRNGKey(0)
    k1, k2, k3, k4, k5, k6, k7, k8 = jax.random.split(key, 8)

    # Case 1: NCHW f32, D = 1024 (128-aligned), reduction='mean'.
    pred1 = jax.nn.sigmoid(jax.random.normal(k1, (2, 4, 16, 16), dtype=jnp.float32))
    targ1 = (jax.random.uniform(k2, (2, 4, 16, 16)) > 0.5).astype(jnp.float32)
    out1 = binary_dice_loss(pred1, targ1, smooth=1.0, p=2, reduction="mean")
    jax.block_until_ready(out1)
    ref1 = jnp.mean(_ref_dice(pred1, targ1, smooth=1.0, p=2))
    assert jnp.allclose(out1, ref1, rtol=1e-5, atol=1e-6), (out1, ref1)

    # Case 2: odd D = 385 (ragged tail handled in the wrapper, no jnp.pad),
    # p=3 exercises the integer-power VALU path, reduction='none'.
    pred2 = jax.nn.sigmoid(jax.random.normal(k3, (3, 5, 7, 11), dtype=jnp.float32))
    targ2 = (jax.random.uniform(k4, (3, 5, 7, 11)) > 0.5).astype(jnp.float32)
    out2 = binary_dice_loss(pred2, targ2, smooth=1.0, p=3, reduction="none")
    jax.block_until_ready(out2)
    ref2 = _ref_dice(pred2, targ2, smooth=1.0, p=3)
    assert jnp.allclose(out2, ref2, rtol=1e-5, atol=1e-6), (out2, ref2)

    # Case 3: N=1, D = 5120 with a tiny VMEM tile budget to force multi-step
    # reduction, (8,128) accumulator fold, row-mask on the final step and the
    # small-batch 2-way row split; reduction='sum'.
    pred3 = jax.nn.sigmoid(jax.random.normal(k5, (1, 5, 32, 32), dtype=jnp.float32))
    targ3 = (jax.random.uniform(k6, (1, 5, 32, 32)) > 0.5).astype(jnp.float32)
    out3 = binary_dice_loss(pred3, targ3, smooth=1.0, p=2, reduction="sum",
                            vmem_tile_bytes=8 * 1024)
    jax.block_until_ready(out3)
    ref3 = jnp.sum(_ref_dice(pred3, targ3, smooth=1.0, p=2))
    assert jnp.allclose(out3, ref3, rtol=1e-5, atol=1e-6), (out3, ref3)

    # Case 4: bf16 inputs stream in native dtype, accumulate in f32.
    pred4 = jax.nn.sigmoid(jax.random.normal(k7, (2, 4, 16, 16))).astype(jnp.bfloat16)
    targ4 = (jax.random.uniform(k8, (2, 4, 16, 16)) > 0.5).astype(jnp.bfloat16)
    out4 = binary_dice_loss(pred4, targ4, smooth=1.0, p=2, reduction="mean")
    jax.block_until_ready(out4)
    ref4 = jnp.mean(_ref_dice(pred4, targ4, smooth=1.0, p=2))
    assert jnp.allclose(out4, ref4, rtol=1e-4, atol=1e-5), (out4, ref4)

    print("KERNEL_OK")
</pallas_src>

<mosaic_0001>
module attributes {stable_mosaic.version = 11 : i64} {
  func.func @_dice_kernel(%arg0: i32, %arg1: i32, %arg2: memref<1x8x128xf32, #tpu.memory_space<vmem>>, %arg3: memref<1x8x128xf32, #tpu.memory_space<vmem>>, %arg4: memref<1x8x128xf32, #tpu.memory_space<vmem>>, %arg5: memref<1x8x128xf32, #tpu.memory_space<vmem>>, %arg6: memref<8x128xf32, #tpu.memory_space<vmem>>, %arg7: memref<8x128xf32, #tpu.memory_space<vmem>>) attributes {dimension_semantics = [#tpu.dimension_semantics<parallel>, #tpu.dimension_semantics<arbitrary>], iteration_bounds = array<i64: 2, 1>, scalar_prefetch = 0 : i64, scratch_operands = 2 : i64, tpu.core_type = #tpu.core_type<tc>, window_params = [{transform_indices = @transform_0, window_bounds = array<i64: 1, 8, 128>}, {transform_indices = @transform_1, window_bounds = array<i64: 1, 8, 128>}, {transform_indices = @transform_2, window_bounds = array<i64: 1, 8, 128>}, {transform_indices = @transform_3, window_bounds = array<i64: 1, 8, 128>}]} {
    %c0_i32 = arith.constant 0 : i32
    %0 = arith.cmpi eq, %arg1, %c0_i32 : i32
    %1 = arith.extui %0 : i1 to i32
    %c0_i32_0 = arith.constant 0 : i32
    %2 = arith.cmpi ne, %1, %c0_i32_0 : i32
    scf.if %2 {
      %cst = arith.constant 0.000000e+00 : f32
      %20 = vector.broadcast %cst : f32 to vector<8x128xf32>
      %c0_16 = arith.constant 0 : index
      %c0_17 = arith.constant 0 : index
      %21 = vector.load %arg6[%c0_16, %c0_17] : memref<8x128xf32, #tpu.memory_space<vmem>>, vector<8x128xf32>
      tpu.vector_store %arg6[%c0_16, %c0_17], %20 {strides = array<i32>} : memref<8x128xf32, #tpu.memory_space<vmem>>, vector<8x128xf32>,
      %cst_18 = arith.constant 0.000000e+00 : f32
      %22 = vector.broadcast %cst_18 : f32 to vector<8x128xf32>
      %c0_19 = arith.constant 0 : index
      %c0_20 = arith.constant 0 : index
      %23 = vector.load %arg7[%c0_19, %c0_20] : memref<8x128xf32, #tpu.memory_space<vmem>>, vector<8x128xf32>
      tpu.vector_store %arg7[%c0_19, %c0_20], %22 {strides = array<i32>} : memref<8x128xf32, #tpu.memory_space<vmem>>, vector<8x128xf32>,
    } else {
    }
    %c0 = arith.constant 0 : index
    %c0_1 = arith.constant 0 : index
    %c0_2 = arith.constant 0 : index
    %3 = vector.load %arg2[%c0, %c0_1, %c0_2] : memref<1x8x128xf32, #tpu.memory_space<vmem>>, vector<1x8x128xf32>
    %4 = vector.shape_cast %3 : vector<1x8x128xf32> to vector<8x128xf32>
    %c0_3 = arith.constant 0 : index
    %c0_4 = arith.constant 0 : index
    %c0_5 = arith.constant 0 : index
    %5 = vector.load %arg3[%c0_3, %c0_4, %c0_5] : memref<1x8x128xf32, #tpu.memory_space<vmem>>, vector<1x8x128xf32>
    %6 = vector.shape_cast %5 : vector<1x8x128xf32> to vector<8x128xf32>
    %7 = arith.mulf %4, %6 : vector<8x128xf32>
    %8 = arith.mulf %4, %4 : vector<8x128xf32>
    %9 = arith.mulf %6, %6 : vector<8x128xf32>
    %10 = arith.addf %8, %9 : vector<8x128xf32>
    %c0_6 = arith.constant 0 : index
    %c0_7 = arith.constant 0 : index
    %11 = vector.load %arg6[%c0_6, %c0_7] : memref<8x128xf32, #tpu.memory_space<vmem>>, vector<8x128xf32>
    %12 = arith.addf %11, %7 : vector<8x128xf32>
    %c0_8 = arith.constant 0 : index
    %c0_9 = arith.constant 0 : index
    %13 = vector.load %arg6[%c0_8, %c0_9] : memref<8x128xf32, #tpu.memory_space<vmem>>, vector<8x128xf32>
    tpu.vector_store %arg6[%c0_8, %c0_9], %12 {strides = array<i32>} : memref<8x128xf32, #tpu.memory_space<vmem>>, vector<8x128xf32>,
    %c0_10 = arith.constant 0 : index
    %c0_11 = arith.constant 0 : index
    %14 = vector.load %arg7[%c0_10, %c0_11] : memref<8x128xf32, #tpu.memory_space<vmem>>, vector<8x128xf32>
    %15 = arith.addf %14, %10 : vector<8x128xf32>
    %c0_12 = arith.constant 0 : index
    %c0_13 = arith.constant 0 : index
    %16 = vector.load %arg7[%c0_12, %c0_13] : memref<8x128xf32, #tpu.memory_space<vmem>>, vector<8x128xf32>
    tpu.vector_store %arg7[%c0_12, %c0_13], %15 {strides = array<i32>} : memref<8x128xf32, #tpu.memory_space<vmem>>, vector<8x128xf32>,
    %c0_i32_14 = arith.constant 0 : i32
    %17 = arith.cmpi eq, %arg1, %c0_i32_14 : i32
    %18 = arith.extui %17 : i1 to i32
    %c0_i32_15 = arith.constant 0 : i32
    %19 = arith.cmpi ne, %18, %c0_i32_15 : i32
    scf.if %19 {
      %c0_16 = arith.constant 0 : index
      %c0_17 = arith.constant 0 : index
      %20 = vector.load %arg6[%c0_16, %c0_17] : memref<8x128xf32, #tpu.memory_space<vmem>>, vector<8x128xf32>
      %21 = vector.shape_cast %20 : vector<8x128xf32> to vector<1x8x128xf32>
      %cst = arith.constant dense<0.000000e+00> : vector<1xf32>
      %22 = vector.multi_reduction <add>, %21, %cst [1, 2] : vector<1x8x128xf32> to vector<1xf32>
      %23 = vector.shape_cast %22 : vector<1xf32> to vector<1x1x1xf32>
      %24 = vector.extract %23[0, 0, 0] : f32 from vector<1x1x1xf32>
      %25 = vector.broadcast %24 : f32 to vector<1x8x128xf32>
      %c0_18 = arith.constant 0 : index
      %c0_19 = arith.constant 0 : index
      %c0_20 = arith.constant 0 : index
      %26 = vector.load %arg4[%c0_18, %c0_19, %c0_20] : memref<1x8x128xf32, #tpu.memory_space<vmem>>, vector<1x8x128xf32>
      tpu.vector_store %arg4[%c0_18, %c0_19, %c0_20], %25 {strides = array<i32>} : memref<1x8x128xf32, #tpu.memory_space<vmem>>, vector<1x8x128xf32>,
      %c0_21 = arith.constant 0 : index
      %c0_22 = arith.constant 0 : index
      %27 = vector.load %arg7[%c0_21, %c0_22] : memref<8x128xf32, #tpu.memory_space<vmem>>, vector<8x128xf32>
      %28 = vector.shape_cast %27 : vector<8x128xf32> to vector<1x8x128xf32>
      %cst_23 = arith.constant dense<0.000000e+00> : vector<1xf32>
      %29 = vector.multi_reduction <add>, %28, %cst_23 [1, 2] : vector<1x8x128xf32> to vector<1xf32>
      %30 = vector.shape_cast %29 : vector<1xf32> to vector<1x1x1xf32>
      %31 = vector.extract %30[0, 0, 0] : f32 from vector<1x1x1xf32>
      %32 = vector.broadcast %31 : f32 to vector<1x8x128xf32>
      %c0_24 = arith.constant 0 : index
      %c0_25 = arith.constant 0 : index
      %c0_26 = arith.constant 0 : index
      %33 = vector.load %arg5[%c0_24, %c0_25, %c0_26] : memref<1x8x128xf32, #tpu.memory_space<vmem>>, vector<1x8x128xf32>
      tpu.vector_store %arg5[%c0_24, %c0_25, %c0_26], %32 {strides = array<i32>} : memref<1x8x128xf32, #tpu.memory_space<vmem>>, vector<1x8x128xf32>,
    } else {
    }
    return
  }
  func.func @transform_0(%arg0: i32, %arg1: i32) -> (i32, i32, i32) {
    %c0_i32 = arith.constant 0 : i32
    %c0_i32_0 = arith.constant 0 : i32
    return %arg0, %arg1, %c0_i32 : i32, i32, i32
  }
  func.func @transform_1(%arg0: i32, %arg1: i32) -> (i32, i32, i32) {
    %c0_i32 = arith.constant 0 : i32
    %c0_i32_0 = arith.constant 0 : i32
    return %arg0, %arg1, %c0_i32 : i32, i32, i32
  }
  func.func @transform_2(%arg0: i32, %arg1: i32) -> (i32, i32, i32) {
    %c0_i32 = arith.constant 0 : i32
    %c0_i32_0 = arith.constant 0 : i32
    %c0_i32_1 = arith.constant 0 : i32
    return %arg0, %c0_i32, %c0_i32_0 : i32, i32, i32
  }
  func.func @transform_3(%arg0: i32, %arg1: i32) -> (i32, i32, i32) {
    %c0_i32 = arith.constant 0 : i32
    %c0_i32_0 = arith.constant 0 : i32
    %c0_i32_1 = arith.constant 0 : i32
    return %arg0, %c0_i32, %c0_i32_0 : i32, i32, i32
  }
}

</mosaic_0001>

<bundles_post_ra>
// kernel: tpu_custom_call.1
= control target key start
LH: loop header
LB: loop body
LE: loop exit
PB: predicated region body
PF: predicated region fallthrough
CT: control target
= control target key end

     0   :  { %9 = vsyncpa [#allocation5], 0  ;;  %s964_s0 = inlined_call_operand.hbm [shape: f32[2,8,128], index: 0, kind: input, shape index: {}]   ;;  %s965_s1 = inlined_call_operand.hbm [shape: f32[2,8,128], index: 1, kind: input, shape index: {}]   ;;  %s966_s2 = inlined_call_operand.hbm [shape: f32[2,8,128], index: 2, kind: output, shape index: {0}]   ;;  %s967_s3 = inlined_call_operand.hbm [shape: f32[2,8,128], index: 3, kind: output, shape index: {1}]  }
   0x1   :  { %11 = vsyncpa [#allocation5 + $0x1], 0 }
   0x2   :  { %12 = vsyncpa [#allocation8], 0 }
   0x3   :  { %14 = vsyncpa [#allocation8 + $0x1], 0 }
   0x4   :  { %15 = vsyncpa [#allocation6], 0 }
   0x5   :  { %17 = vsyncpa [#allocation6 + $0x1], 0 }
   0x6   :  { %18 = vsyncpa [#allocation11], 0 }
   0x7   :  { %20 = vsyncpa [#allocation11 + $0x1], 0  ;;  %s755_s12 = smov 0   ;;  %s757_s13 = smov 0  }
   0x8   :  { %s759_s14 = smov 0   ;;  %s761_s15 = smov 0  }
   0x9   :  { %s763_s16 = smov 0   ;;  %s765_s17 = smov 0  }
   0xa LB: > { %s464_s18 = sadd.s32 4294967295, %s729_s17   ;;  %s465_s19 = sadd.s32 4294967294, %s729_s17   ;;  %s729_s17 = sphi %s765_s17, %s26_s17   ;;  %s725_s16 = sphi %s763_s16, %s979_s16   ;;  %s721_s15 = sphi %s761_s15, %s978_s15   ;;  %s717_s14 = sphi %s759_s14, %s977_s14   ;;  %s713_s13 = sphi %s757_s13, %s976_s13   ;;  %s709_s12 = sphi %s755_s12, %s975_s12  }
   0xb   : > { %s38_s20 = sadd.s32 1, %s725_s16  ;;  %s47_s21 = sadd.s32 1, %s717_s14 }
   0xc   : > { %p40_p0 = scmp.ge.s32.totalorder %s38_s20, 2  ;;  %p54_p1 = scmp.ne.s32.totalorder %s717_s14, %s713_s13 }
   0xd   : > { %p55_p2 = scmp.eq.s32.totalorder %s729_s17, 0  ;;  %p60_p3 = scmp.ne.s32.totalorder %s713_s13, %s709_s12 }
   0xe   : > { %s981_s20 = smov (%p40_p0, %s38_s20), 0  ;;  %p61_p5 = scmp.eq.s32.totalorder %s464_s18, 0 }
   0xf   : > { %p796_p4 = por %p55_p2, %p54_p1  ;;  %s42_s23 = ssub.s32 %s725_s16, %s981_s20 }
  0x10   : > { %p112_p6 = scmp.eq.s32.totalorder %s464_s18, 1  ;;  %p45_p7 = scmp.eq.s32.totalorder %s42_s23, 0 }
  0x11   : > { %p802_p8 = por %p61_p5, %p60_p3  ;;  %p118_p10 = scmp.eq.s32.totalorder %s465_s19, 1 }
  0x12   : > { %p806_p9 = por %p112_p6, %p54_p1  ;;  %p509_p13 = scmp.lt.s32.totalorder %s729_s17, 2 }
  0x13   : > { %s811_s26 = scalar_select %p45_p7, %s717_s14, %s47_s21  }
  0x14   : > { %p813_p11 = por %p118_p10, %p60_p3  ;;  %s820_s28 = sand.u32 1, %s717_s14  }
  0x15   : > { %s468_s29 = sshll.u32 %s820_s28, 3  ;;  %s469_s30 = sshll.u32 %s725_s16, 7 }
  0x16   : > { %s174_s6 = scalar_lea.hbm %s964_s0, %s469_s30  ;;  %s168_s7 = scalar_lea.vmem [#allocation4], %s468_s29 }
  0x17   : > { %s176_s8 = sshll.u32 %s168_s7, 4  ;;  %p829_p0 = pnand %p509_p13, %p796_p4  ;;  %s177_s8 = int_to_ptr.vmem [resolvable:$true] %s176_s8 }
  0x18   : > { %p472_p1 = scmp.ge.s32.totalorder %s729_s17, 1  ;;  %p200_p2 = scmp.lt.s32.totalorder %s729_s17, 3 }
  0x19   : > { %s165_s10 = scalar_lea.sflag [#allocation5], %s820_s28  ;;  %p561_p3 = pneg %p829_p0 }
  0x1a   : > { %s572_s11 = scalar_lea.vmem %s177_s8, 128  ;;  %s731_s18 = smov [#allocation4]  }
  0x1b   : > { %p573_p5 = scmp.ne.s32.totalorder %s177_s8, %s572_s11  ;;  %s577_s19 = sshll.u32 %s731_s18, 4  ;;  %s578_s19 = int_to_ptr.vmem [resolvable:$false] %s577_s19 }
  0x1c   : > { %s579_s21 = scalar_lea.vmem %s578_s19, 256  ;;  %p580_p4 = scmp.lt.s32.totalorder %s177_s8, %s578_s19 }
  0x1d   : > { %p575_p6 = pnand %p573_p5, %p561_p3  ;;  %p581_p10 = scmp.lt.s32.totalorder %s579_s21, %s572_s11 }
  0x1f   : > { %p576_p7 = pneg %p575_p6  ;;  %p582_p13 = por %p581_p10, %p580_p4 }
  0x21   : > { %p583_p12 = pnand %p582_p13, %p576_p7 }
  0x23   : > { %586 = shalt.err (!%p583_p12)
}
  0x24   : > { %498 = dma.hbm_to_vmem [thread:$0]  (!%p829_p0), %s174_s6, 128, %s177_s8, %s165_s10  }
  0x25   : > { %p847_p5 = pnand %p472_p1, %p200_p2  ;;  %s193_s5 = scalar_lea.hbm %s965_s1, %s469_s30 }
  0x26   : > { %s187_s7 = scalar_lea.vmem [#allocation7], %s468_s29  ;;  %s184_s18 = scalar_lea.sflag [#allocation8], %s820_s28 }
  0x27   : > { %s195_s11 = sshll.u32 %s187_s7, 4  ;;  %s732_s6 = smov [#allocation7]   ;;  %s196_s11 = int_to_ptr.vmem [resolvable:$true] %s195_s11 }
  0x28   : > { %s600_s19 = scalar_lea.vmem %s196_s11, 128  ;;  %s605_s8 = sshll.u32 %s732_s6, 4  ;;  %s606_s8 = int_to_ptr.vmem [resolvable:$false] %s605_s8 }
  0x29   : > { %p601_p12 = scmp.ne.s32.totalorder %s196_s11, %s600_s19  ;;  %s607_s10 = scalar_lea.vmem %s606_s8, 256 }
  0x2a   : > { %p608_p1 = scmp.lt.s32.totalorder %s196_s11, %s606_s8  ;;  %p609_p2 = scmp.lt.s32.totalorder %s607_s10, %s600_s19 }
  0x2b   : > { %p603_p6 = pnand %p601_p12, %p561_p3 }
  0x2c   : > { %p610_p4 = por %p609_p2, %p608_p1 }
  0x2d   : > { %p604_p7 = pneg %p603_p6 }
  0x2f   : > { %p611_p10 = pnand %p610_p4, %p604_p7 }
  0x31   : > { %614 = shalt.err (!%p611_p10)
}
  0x32   : > { %501 = dma.hbm_to_vmem [thread:$0]  (!%p829_p0), %s193_s5, 128, %s196_s11, %s184_s18  }
  0x33   : > { %204 = sbr.rel (%p847_p5) target bundleno = 299 (0x12b), region = 28  ;;  %s863_s28 = sand.u32 (!%p847_p5), 1, %s713_s13  }
  0x34   : > { %s866_s29 = sshll.u32 (!%p847_p5), %s863_s28, 3  ;;  %s207_s30 = scalar_lea.sflag (!%p847_p5), [#allocation5], %s863_s28 }
  0x35   : > { %s210_s21 = scalar_lea.vmem (!%p847_p5), [#allocation4], %s866_s29 }
  0x38   : > { %692 = dma.done.wait (%p802_p8), %s207_s30, 128  }
  0x39   : > { %694 = vsyncadd (%p802_p8), %s207_s30, 4294967168  ;;  %s216_s9 = scalar_lea.sflag [#allocation8], %s863_s28  ;;  %s219_s22 = scalar_lea.vmem [#allocation7], %s866_s29 }
  0x3a   : > { %696 = dma.done.wait (%p802_p8), %s216_s9, 128  }
  0x3b   : > { %698 = vsyncadd (%p802_p8), %s216_s9, 4294967168  ;;  %v258_v0 = vld [vmem:[%s210_s21] sm:$0xff]  ;;  %v259_v1 = vld [vmem:[%s219_s22] sm:$0xff]  ;;  %s479_s24 = sshll.u32 %s721_s15, 7  ;;  %s244_s23 = scalar_lea.vmem [#allocation9], %s866_s29 }
  0x3c   : > { %v260_v2 = vmul.f32 %v259_v1, %v258_v0  ;;  %v261_v3 = vmul.f32 %v258_v0, %v258_v0  ;;  %v262_v4 = vmul.f32 %v259_v1, %v259_v1  ;;  %s316_s4 = sshll.u32 %s244_s23, 4  ;;  %s251_s5 = scalar_lea.vmem [#allocation10], %s866_s29  ;;  %s892_s4 = int_to_ptr.vmem [resolvable:$true] %s316_s4 }
  0x3d   : > { %s329_s7 = sshll.u32 %s251_s5, 4  ;;  %s890_s19 = scalar_lea.hbm %s966_s2, %s479_s24  ;;  %s894_s7 = int_to_ptr.vmem [resolvable:$true] %s329_s7 }
  0x3e   : > { %274 = vadd.xlane.f32.xlu0 %v260_v2  ;;  %v263_v5 = vadd.f32 %v262_v4, %v261_v3  ;;  %s298_s8 = scalar_lea.sflag [#allocation6], %s863_s28  ;;  %s615_s10 = scalar_lea.vmem %s892_s4, 128 }
  0x3f   : > { %p616_p8 = scmp.ne.s32.totalorder %s892_s4, %s615_s10  ;;  %s733_s30 = smov [#allocation9]  }
  0x40   : > { %s619_s21 = sshll.u32 %s733_s30, 4  ;;  %s620_s21 = int_to_ptr.vmem [resolvable:$false] %s619_s21 }
  0x41   : > { %p617_p0 = pnand %p616_p8, %p806_p9  ;;  %s621_s9 = scalar_lea.vmem %s620_s21, 256 }
  0x42   : > { %286 = vadd.xlane.f32.xlu0 %v263_v5  ;;  %p622_p13 = scmp.lt.s32.totalorder %s892_s4, %s620_s21  ;;  %p623_p5 = scmp.lt.s32.totalorder %s621_s9, %s615_s10 }
  0x43   : > { %p618_p3 = pneg %p617_p0 }
  0x44   : > { %p624_p12 = por %p623_p5, %p622_p13 }
  0x46   : > { %p625_p6 = pnand %p624_p12, %p618_p3 }
  0xc7   : > { %v275_v6 = vpop.xlane.xlu0 %274 }
  0xc8   : > { %v276_v7 = vrot.slane %v275_v6, 4 }
  0xca   : > { %v277_v8 = vadd.f32 %v276_v7, %v275_v6 }
  0xcb   : > { %v287_v9 = vpop.xlane.xlu0 %286 }
  0xcc   : > { %v278_v10 = vrot.slane %v277_v8, 2  ;;  %v288_v11 = vrot.slane %v287_v9, 4 }
  0xce   : > { %v289_v12 = vadd.f32 %v288_v11, %v287_v9  ;;  %v279_v13 = vadd.f32 %v278_v10, %v277_v8 }
  0xd0   : > { %v290_v14 = vrot.slane %v289_v12, 2  ;;  %v280_v15 = vrot.slane %v279_v13, 1 }
  0xd2   : > { %v291_v16 = vadd.f32 %v290_v14, %v289_v12  ;;  %v281_v17 = vadd.f32 %v280_v15, %v279_v13 }
  0xd4   : > { %483 = vpush %v281_v17  ;;  %v292_v18 = vrot.slane %v291_v16, 1 }
  0xd6   : > { %v293_v19 = vadd.f32 %v292_v18, %v291_v16 }
  0xd8   : > { %485 = vpush %v293_v19 }
 0x105   : > { %s484_s6 = spop %483 }
 0x106   : > { %v283_v20 = vstv %s484_s6 }
 0x107   : > { %284 = vst [vmem:[%s244_s23] sm:$0xff] %v283_v20 }
 0x108   : > { %628 = shalt.err (!%p625_p6)
}
 0x109   : > { %s629_s22 = scalar_lea.hbm %s890_s19, 128  ;;  %s633_s18 = scalar_lea.hbm %s966_s2, 256 }
 0x10a   : > { %p630_p7 = scmp.ne.s32.totalorder %s890_s19, %s629_s22  ;;  %p634_p4 = scmp.lt.s32.totalorder %s890_s19, %s966_s2 }
 0x10b   : > { %p635_p10 = scmp.lt.s32.totalorder %s633_s18, %s629_s22 }
 0x10c   : > { %p631_p1 = pnand %p630_p7, %p806_p9 }
 0x10d   : > { %p636_p8 = por %p635_p10, %p634_p4 }
 0x10e   : > { %p632_p2 = pneg %p631_p1 }
 0x110   : > { %p637_p0 = pnand %p636_p8, %p632_p2 }
 0x112   : > { %640 = shalt.err (!%p637_p0)
}
 0x113   : > { %491 = dma.vmem_to_hbm [thread:$0]  (%p806_p9), %s892_s4, 128, %s890_s19, %s298_s8  }
 0x114   : > { %s486_s10 = spop %485  ;;  %s327_s22 = scalar_lea.hbm %s967_s3, %s479_s24 }
 0x115   : > { %v295_v21 = vstv %s486_s10  ;;  %s303_s23 = scalar_lea.sflag [#allocation11], %s863_s28  ;;  %s641_s11 = scalar_lea.vmem %s894_s7, 128 }
 0x116   : > { %296 = vst [vmem:[%s251_s5] sm:$0xff] %v295_v21  ;;  %p642_p3 = scmp.ne.s32.totalorder %s894_s7, %s641_s11  ;;  %s734_s18 = smov [#allocation10]  }
 0x117   : > { %s645_s6 = sshll.u32 %s734_s18, 4  ;;  %s646_s6 = int_to_ptr.vmem [resolvable:$false] %s645_s6 }
 0x118   : > { %p643_p13 = pnand %p642_p3, %p806_p9  ;;  %s647_s30 = scalar_lea.vmem %s646_s6, 256 }
 0x119   : > { %p648_p12 = scmp.lt.s32.totalorder %s894_s7, %s646_s6  ;;  %p649_p6 = scmp.lt.s32.totalorder %s647_s30, %s641_s11 }
 0x11a   : > { %p644_p5 = pneg %p643_p13 }
 0x11b   : > { %p650_p7 = por %p649_p6, %p648_p12 }
 0x11d   : > { %p651_p1 = pnand %p650_p7, %p644_p5 }
 0x11f   : > { %654 = shalt.err (!%p651_p1)
}
 0x120   : > { %s655_s15 = scalar_lea.hbm %s327_s22, 128  ;;  %s659_s24 = scalar_lea.hbm %s967_s3, 256 }
 0x121   : > { %p656_p2 = scmp.ne.s32.totalorder %s327_s22, %s655_s15  ;;  %p660_p8 = scmp.lt.s32.totalorder %s327_s22, %s967_s3 }
 0x122   : > { %p661_p0 = scmp.lt.s32.totalorder %s659_s24, %s655_s15 }
 0x123   : > { %p657_p4 = pnand %p656_p2, %p806_p9 }
 0x124   : > { %p662_p3 = por %p661_p0, %p660_p8 }
 0x125   : > { %p658_p10 = pneg %p657_p4 }
 0x127   : > { %p663_p13 = pnand %p662_p3, %p658_p10 }
 0x129   : > { %666 = shalt.err (!%p663_p13)
}
 0x12a   : > { %492 = dma.vmem_to_hbm [thread:$0]  (%p806_p9), %s894_s7, 128, %s327_s22, %s303_s23  }
 0x12b PF: > { %s341_s19 = sand.u32 1, %s709_s12   ;;  %p974_p5 = scmp.ge.s32.totalorder %s729_s17, 2 }
 0x12c   : > { %s342_s8 = scalar_lea.sflag [#allocation6], %s341_s19 }
 0x12d   : > { %p503_p12 = pnand %p974_p5, %p813_p11 }
 0x12f   : > { %p504_p6 = pneg %p503_p12 }
 0x131   : > { %700 = dma.done.wait (%p504_p6), %s342_s8, 128  }
 0x132   : > { %702 = vsyncadd (%p504_p6), %s342_s8, 4294967168  ;;  %s351_s10 = scalar_lea.sflag [#allocation11], %s341_s19 }
 0x133   : > { %704 = dma.done.wait (%p504_p6), %s351_s10, 128  }
 0x134   : > { %706 = vsyncadd (%p504_p6), %s351_s10, 4294967168  ;;  %s26_s17 = sadd.s32 1, %s729_s17   ;;  %s975_s12 = smov %s713_s13 }
 0x135   : > { %p23_p7 = scmp.ge.s32.totalorder %s26_s17, 4   ;;  %s976_s13 = smov %s717_s14 }
 0x136   : > { %s977_s14 = smov %s811_s26  ;;  %s978_s15 = smov %s725_s16 }
 0x137   : > { %s979_s16 = smov %s981_s20  ;;  %25 = sbr.rel (!%p23_p7) target bundleno = 10 (0xa), region = 111 }
 0x13c   :  { %356 = vsyncpa [#allocation5], 1 }
 0x13d   :  { %358 = vsyncpa [#allocation5 + $0x1], 1 }
 0x13e   :  { %359 = vsyncpa [#allocation8], 1 }
 0x13f   :  { %361 = vsyncpa [#allocation8 + $0x1], 1 }
 0x140   :  { %362 = vsyncpa [#allocation6], 1 }
 0x141   :  { %364 = vsyncpa [#allocation6 + $0x1], 1 }
 0x142   :  { %365 = vsyncpa [#allocation11], 1 }
 0x143   :  { %367 = vsyncpa [#allocation11 + $0x1], 1 }

</bundles_post_ra>
